<compile_context>
chip_gen: v6e
topology: v6e:2x2x1
jax: 0.10.0
libtpu: 0.0.40
codegen_flags: <defaults>
</compile_context>

<pallas_src>
import functools

import jax
import jax.numpy as jnp
from jax import lax
from jax.experimental import pallas as pl
from jax.experimental.pallas import tpu as pltpu

NUM_LETTERS = 8
NUM_FEATURES = NUM_LETTERS * 2 + 2   # 18
NUM_STEPS = 4
SOS_token = 0


def _block_log_softmax(logits, m=None):
    if m is None:
        m = jnp.max(logits, axis=-1, keepdims=True)
    lse = jnp.log(jnp.sum(jnp.exp(logits - m), axis=-1, keepdims=True)) + m
    return logits - lse


def _gru_step(gi, gh, h, H):
    # PyTorch gate order (r, z, n); one sigmoid over the contiguous (B, 2H) slab.
    # TODO(synk): gate-column reordering to shave 1-2 XLU lane rotates per step was
    # suggested by review but needs a Mosaic-dump check; kept PyTorch order for clarity.
    rz = jax.nn.sigmoid(gi[:, :2 * H] + gh[:, :2 * H])
    r = rz[:, :H]
    z = rz[:, H:]
    n = jnp.tanh(gi[:, 2 * H:] + r * gh[:, 2 * H:])
    return n + z * (h - n)          # == (1 - z) * n + z * h


def _decoder_tf_kernel(tgt_ref, h0_ref, wihb_ref, whho_ref, bhho_ref,
                       logp_ref, hout_ref):
    """Teacher-forcing decoder: tokens known up front, gi hoisted out of the loop."""
    B, H = h0_ref.shape
    F = NUM_FEATURES
    G = 3 * H
    O = whho_ref.shape[1] - G
    S = NUM_STEPS

    h = h0_ref[...]                                        # (B, H)
    w = whho_ref[...]                                      # (H, 3H+O) == [W_hh^T|W_out^T]
    b_full = jnp.broadcast_to(bhho_ref[...], (B, G + O))   # bias broadcast hoisted once
    wih_b = wihb_ref[...]                                  # (F, 3H) == W_ih^T + b_ih

    # Step-major one-hot for ALL steps built in-kernel from the raw (B, S) int32 target
    # tensor (no wrapper-side token-prep HLOs), then ONE hoisted MXU matmul for every
    # step's input projection (b_ih is folded into wih_b rows, so this is exact).
    tgt = tgt_ref[...]                                     # (B, S) int32
    feat_iota = lax.broadcasted_iota(jnp.int32, (B, F), 1)
    onehots = [(feat_iota == SOS_token).astype(jnp.float32)]          # step 0 = SOS
    for i in range(1, S):
        onehots.append((feat_iota == tgt[:, i - 1:i]).astype(jnp.float32))
    onehot_all = jnp.concatenate(onehots, axis=0)                     # (S*B, F)
    gi_all = jnp.dot(onehot_all, wih_b,
                     preferred_element_type=jnp.float32)              # (S*B, 3H)

    logits_list = []
    for i in range(S):
        # One fused MXU op per step: gh for step i, logits for step i-1.
        gfull = jnp.dot(h, w, preferred_element_type=jnp.float32) + b_full   # (B, 3H+O)
        if i > 0:
            logits_list.append(gfull[:, G:])               # raw logits of step i-1
        gi = gi_all[i * B:(i + 1) * B, :]
        h = _gru_step(gi, gfull[:, :G], h, H)

    # Drain the one-step software pipeline: last step's logits.
    gfin = jnp.dot(h, w, preferred_element_type=jnp.float32) + b_full
    logits_list.append(gfin[:, G:])
    hout_ref[...] = h

    # Deferred log_softmax (off the recurrence chain) + ONE lane-aligned slab store.
    logps = [_block_log_softmax(logits) for logits in logits_list]
    logp_ref[...] = jnp.concatenate(logps, axis=1)         # (B, S*O)


def _decoder_greedy_kernel(h0_ref, wihb_ref, whho_ref, bhho_ref, logp_ref, hout_ref):
    """Free-running decoder: next input = argmax of the previous step's logits."""
    B, H = h0_ref.shape
    F = NUM_FEATURES
    G = 3 * H
    O = whho_ref.shape[1] - G
    S = NUM_STEPS

    h = h0_ref[...]
    w = whho_ref[...]
    b_full = jnp.broadcast_to(bhho_ref[...], (B, G + O))   # hoisted bias broadcast
    wih_b = wihb_ref[...]                                  # (F, 3H), natural 3-vreg layout

    feat_iota = lax.broadcasted_iota(jnp.int32, (B, F), 1)
    out_iota = lax.broadcasted_iota(jnp.int32, (B, O), 1)

    # Step-0 input is SOS for every row; hoist the sublane broadcast out of the gates.
    gi = jnp.broadcast_to(wih_b[SOS_token:SOS_token + 1, :], (B, G))

    pending = []   # (raw logits, row max) per step; log_softmax deferred past the loop
    for i in range(S):
        gfull = jnp.dot(h, w, preferred_element_type=jnp.float32) + b_full   # (B, 3H+O)
        if i > 0:
            logits = gfull[:, G:]                          # logits of step i-1
            m = jnp.max(logits, axis=-1, keepdims=True)    # needed now for argmax only
            tok = jnp.min(jnp.where(logits >= m, out_iota, jnp.int32(O)),
                          axis=-1, keepdims=True)          # first-index argmax, (B, 1)
            # Single one-hot MXU matmul for the next input projection (no 18 persistent
            # row vregs / VPU select tree keeping register pressure on the serial chain).
            onehot = (feat_iota == tok).astype(jnp.float32)
            gi = jnp.dot(onehot, wih_b, preferred_element_type=jnp.float32)
            pending.append((logits, m))
        h = _gru_step(gi, gfull[:, :G], h, H)

    gfin = jnp.dot(h, w, preferred_element_type=jnp.float32) + b_full
    last_logits = gfin[:, G:]
    pending.append((last_logits, jnp.max(last_logits, axis=-1, keepdims=True)))
    hout_ref[...] = h

    logps = [_block_log_softmax(logits, m) for logits, m in pending]
    logp_ref[...] = jnp.concatenate(logps, axis=1)         # (B, S*O), single store


def make_decoder_params(key, feature_size, hidden_size, output_size):
    """Deterministic synthetic parameters (PyTorch-style uniform(-1/sqrt(H), 1/sqrt(H)))."""
    H, F, O = hidden_size, feature_size, output_size
    ks = jax.random.split(key, 6)
    s = 1.0 / jnp.sqrt(jnp.float32(H))
    wih = jax.random.uniform(ks[0], (F, 3 * H), jnp.float32, -s, s)   # W_ih^T
    whh = jax.random.uniform(ks[1], (H, 3 * H), jnp.float32, -s, s)   # W_hh^T
    bih = jax.random.uniform(ks[2], (1, 3 * H), jnp.float32, -s, s)
    bhh = jax.random.uniform(ks[3], (1, 3 * H), jnp.float32, -s, s)
    wout = jax.random.uniform(ks[4], (H, O), jnp.float32, -s, s)      # W_out^T
    bout = jax.random.uniform(ks[5], (1, O), jnp.float32, -s, s)
    return (wih, whh, bih, bhh, wout, bout)


def prepare_decoder_params(params):
    """One-time weight fusion for the kernel (concat / bias folding done once)."""
    wih, whh, bih, bhh, wout, bout = params
    H = whh.shape[0]
    O = wout.shape[1]
    # Single-MXU-pass guard: the fused head width must fit one lane tile on v5e's
    # 128-wide MXU (v6e/v7x have slack up to ~242). 3H+O = 114 here.
    assert 3 * H + O <= 128, "fused [W_hh^T | W_out^T] must stay <= 128 lanes (v5e MXU)"
    wih_b = wih + bih                              # (F, 3H): b_ih folded into each row
    whho = jnp.concatenate([whh, wout], axis=1)    # (H, 3H+O) == [W_hh^T | W_out^T]
    bhho = jnp.concatenate([bhh, bout], axis=1)    # (1, 3H+O)
    return (wih_b, whho, bhho)


@functools.partial(jax.jit, static_argnums=(0,))
def decoder_forward(batch_size, context_vector, prepared, target_tensor=None):
    """Pallas equivalent of Decoder.forward; returns (log_probs, hidden, None)."""
    wih_b, whho, bhho = prepared
    H = whho.shape[0]
    O = whho.shape[1] - 3 * H
    B = batch_size
    h0 = context_vector.reshape(B, H).astype(jnp.float32)

    vmem = pl.BlockSpec(memory_space=pltpu.MemorySpace.VMEM)
    out_shape = (jax.ShapeDtypeStruct((B, NUM_STEPS * O), jnp.float32),
                 jax.ShapeDtypeStruct((B, H), jnp.float32))

    # Gridless, whole-array VMEM residency: total footprint is tens of KiB, far below
    # the scoped VMEM limit on every generation (no tiling / pipelining needed).  If B
    # grows (best throughput lever: batch up to 128/256 rows to fill the MXU), add a
    # leading batch grid axis with dimension_semantics=("parallel",) so v7x uses both
    # TensorCores.
    if target_tensor is None:
        logp2d, hout = pl.pallas_call(
            _decoder_greedy_kernel,
            out_shape=out_shape,
            in_specs=[vmem, vmem, vmem, vmem],
            out_specs=(vmem, vmem),
        )(h0, wih_b, whho, bhho)
    else:
        # Raw (B, NUM_STEPS) int32 tokens go straight to the kernel; the step-major
        # one-hot is built in-kernel (no wrapper transpose/concat/reshape HLOs).
        tgt = target_tensor.astype(jnp.int32)
        logp2d, hout = pl.pallas_call(
            _decoder_tf_kernel,
            out_shape=out_shape,
            in_specs=[vmem, vmem, vmem, vmem, vmem],
            out_specs=(vmem, vmem),
        )(tgt, h0, wih_b, whho, bhho)

    # Row-major reshape (free) — the lane-dense (B, S*O) kernel output maps directly to
    # the batch-first (B, NUM_STEPS, O) layout of the PyTorch module.
    decoder_outputs = logp2d.reshape(B, NUM_STEPS, O)
    hidden = hout.reshape(1, B, H)                      # PyTorch GRU hidden layout
    return decoder_outputs, hidden, None


def decoder_reference(batch_size, context_vector, params, target_tensor=None):
    """Pure-JAX reference mirroring the PyTorch forward (for correctness check)."""
    wih, whh, bih, bhh, wout, bout = params
    H = whh.shape[0]
    B = batch_size
    h = context_vector.reshape(B, H).astype(jnp.float32)
    tok = jnp.full((B,), SOS_token, jnp.int32)
    outs = []
    for i in range(NUM_STEPS):
        onehot = jax.nn.one_hot(tok, NUM_FEATURES, dtype=jnp.float32)
        gi = onehot @ wih + bih
        gh = h @ whh + bhh
        r = jax.nn.sigmoid(gi[:, :H] + gh[:, :H])
        z = jax.nn.sigmoid(gi[:, H:2 * H] + gh[:, H:2 * H])
        n = jnp.tanh(gi[:, 2 * H:] + r * gh[:, 2 * H:])
        h = (1.0 - z) * n + z * h
        logits = h @ wout + bout
        outs.append(logits)
        if target_tensor is not None:
            tok = target_tensor[:, i].astype(jnp.int32)
        else:
            tok = jnp.argmax(logits, axis=-1).astype(jnp.int32)
    out = jnp.stack(outs, axis=1)
    return jax.nn.log_softmax(out, axis=-1), h.reshape(1, B, H), None


if __name__ == "__main__":
    key = jax.random.PRNGKey(0)
    k_param, k_ctx, k_tgt = jax.random.split(key, 3)

    batch_size = 8
    hidden_size = 32
    output_size = NUM_FEATURES        # output vocabulary == feature vocabulary

    params = make_decoder_params(k_param, NUM_FEATURES, hidden_size, output_size)
    prepared = prepare_decoder_params(params)          # weight fusion done once
    context_vector = jax.random.normal(k_ctx, (1, batch_size, hidden_size), jnp.float32)
    target_tensor = jax.random.randint(k_tgt, (batch_size, NUM_STEPS), 0, NUM_FEATURES,
                                       dtype=jnp.int32)

    # free-running (greedy) path, target_tensor=None
    logp, hidden, _ = decoder_forward(batch_size, context_vector, prepared, None)
    jax.block_until_ready((logp, hidden))
    ref_logp, ref_hidden, _ = decoder_reference(batch_size, context_vector, params, None)
    assert logp.shape == (batch_size, NUM_STEPS, output_size)
    assert hidden.shape == (1, batch_size, hidden_size)
    assert jnp.allclose(logp, ref_logp, atol=1e-5, rtol=1e-5)
    assert jnp.allclose(hidden, ref_hidden, atol=1e-5, rtol=1e-5)

    # teacher-forcing path
    logp_t, hidden_t, _ = decoder_forward(batch_size, context_vector, prepared,
                                          target_tensor)
    jax.block_until_ready((logp_t, hidden_t))
    ref_logp_t, ref_hidden_t, _ = decoder_reference(batch_size, context_vector, params,
                                                    target_tensor)
    assert jnp.allclose(logp_t, ref_logp_t, atol=1e-5, rtol=1e-5)
    assert jnp.allclose(hidden_t, ref_hidden_t, atol=1e-5, rtol=1e-5)

    print("KERNEL_OK")
</pallas_src>

<mosaic_0001>
module attributes {stable_mosaic.version = 11 : i64} {
  func.func @_decoder_greedy_kernel(%arg0: memref<8x32xf32, #tpu.memory_space<vmem>>, %arg1: memref<18x96xf32, #tpu.memory_space<vmem>>, %arg2: memref<32x114xf32, #tpu.memory_space<vmem>>, %arg3: memref<1x114xf32, #tpu.memory_space<vmem>>, %arg4: memref<8x72xf32, #tpu.memory_space<vmem>>, %arg5: memref<8x32xf32, #tpu.memory_space<vmem>>) attributes {dimension_semantics = [], scalar_prefetch = 0 : i64, scratch_operands = 0 : i64, tpu.core_type = #tpu.core_type<tc>} {
    %c0 = arith.constant 0 : index
    %c0_0 = arith.constant 0 : index
    %0 = vector.load %arg0[%c0, %c0_0] : memref<8x32xf32, #tpu.memory_space<vmem>>, vector<8x32xf32>
    %c0_1 = arith.constant 0 : index
    %c0_2 = arith.constant 0 : index
    %1 = vector.load %arg2[%c0_1, %c0_2] : memref<32x114xf32, #tpu.memory_space<vmem>>, vector<32x114xf32>
    %c0_3 = arith.constant 0 : index
    %c0_4 = arith.constant 0 : index
    %2 = vector.load %arg3[%c0_3, %c0_4] : memref<1x114xf32, #tpu.memory_space<vmem>>, vector<1x114xf32>
    %3 = vector.shape_cast %2 : vector<1x114xf32> to vector<1x114xf32>
    %4 = vector.broadcast %3 : vector<1x114xf32> to vector<8x114xf32>
    %c0_5 = arith.constant 0 : index
    %c0_6 = arith.constant 0 : index
    %5 = vector.load %arg1[%c0_5, %c0_6] : memref<18x96xf32, #tpu.memory_space<vmem>>, vector<18x96xf32>
    %6 = tpu.iota {dimensions = array<i32: 1>} : vector<8x18xi32>
    %7 = tpu.iota {dimensions = array<i32: 1>} : vector<8x18xi32>
    %8 = vector.extract_strided_slice %5 {offsets = [0, 0], sizes = [1, 96], strides = [1, 1]} : vector<18x96xf32> to vector<1x96xf32>
    %9 = vector.shape_cast %8 : vector<1x96xf32> to vector<1x96xf32>
    %10 = vector.broadcast %9 : vector<1x96xf32> to vector<8x96xf32>
    %cst = arith.constant dense<0.000000e+00> : vector<8x114xf32>
    %11 = tpu.matmul %0, %1, %cst {dimension_numbers = #tpu.dot_dimension_numbers<[1], [0], [0], [1], [0, 0, 1, 1], [], []>} : vector<8x32xf32>, vector<32x114xf32>, vector<8x114xf32> -> vector<8x114xf32>
    %12 = arith.addf %11, %4 : vector<8x114xf32>
    %13 = vector.extract_strided_slice %12 {offsets = [0, 0], sizes = [8, 96], strides = [1, 1]} : vector<8x114xf32> to vector<8x96xf32>
    %14 = vector.extract_strided_slice %10 {offsets = [0, 0], sizes = [8, 64], strides = [1, 1]} : vector<8x96xf32> to vector<8x64xf32>
    %15 = vector.extract_strided_slice %13 {offsets = [0, 0], sizes = [8, 64], strides = [1, 1]} : vector<8x96xf32> to vector<8x64xf32>
    %16 = arith.addf %14, %15 : vector<8x64xf32>
    %17 = arith.negf %16 : vector<8x64xf32>
    %18 = math.exp %17 : vector<8x64xf32>
    %cst_7 = arith.constant 1.000000e+00 : f32
    %19 = vector.broadcast %cst_7 : f32 to vector<8x64xf32>
    %20 = arith.addf %19, %18 : vector<8x64xf32>
    %21 = arith.divf %19, %20 : vector<8x64xf32>
    %22 = vector.extract_strided_slice %21 {offsets = [0, 0], sizes = [8, 32], strides = [1, 1]} : vector<8x64xf32> to vector<8x32xf32>
    %23 = vector.extract_strided_slice %21 {offsets = [0, 32], sizes = [8, 32], strides = [1, 1]} : vector<8x64xf32> to vector<8x32xf32>
    %24 = vector.extract_strided_slice %10 {offsets = [0, 64], sizes = [8, 32], strides = [1, 1]} : vector<8x96xf32> to vector<8x32xf32>
    %25 = vector.extract_strided_slice %13 {offsets = [0, 64], sizes = [8, 32], strides = [1, 1]} : vector<8x96xf32> to vector<8x32xf32>
    %26 = arith.mulf %22, %25 : vector<8x32xf32>
    %27 = arith.addf %24, %26 : vector<8x32xf32>
    %28 = math.tanh %27 : vector<8x32xf32>
    %29 = arith.subf %0, %28 : vector<8x32xf32>
    %30 = arith.mulf %23, %29 : vector<8x32xf32>
    %31 = arith.addf %28, %30 : vector<8x32xf32>
    %cst_8 = arith.constant dense<0.000000e+00> : vector<8x114xf32>
    %32 = tpu.matmul %31, %1, %cst_8 {dimension_numbers = #tpu.dot_dimension_numbers<[1], [0], [0], [1], [0, 0, 1, 1], [], []>} : vector<8x32xf32>, vector<32x114xf32>, vector<8x114xf32> -> vector<8x114xf32>
    %33 = arith.addf %32, %4 : vector<8x114xf32>
    %34 = vector.extract_strided_slice %33 {offsets = [0, 96], sizes = [8, 18], strides = [1, 1]} : vector<8x114xf32> to vector<8x18xf32>
    %cst_9 = arith.constant dense<0xFF800000> : vector<8xf32>
    %35 = vector.multi_reduction <maximumf>, %34, %cst_9 [1] : vector<8x18xf32> to vector<8xf32>
    %36 = vector.shape_cast %35 : vector<8xf32> to vector<8x1xf32>
    %37 = vector.broadcast %36 : vector<8x1xf32> to vector<8x18xf32>
    %38 = arith.cmpf oge, %34, %37 : vector<8x18xf32>
    %c18_i32 = arith.constant 18 : i32
    %39 = vector.broadcast %c18_i32 : i32 to vector<8x18xi32>
    %40 = arith.select %38, %7, %39 : vector<8x18xi1>, vector<8x18xi32>
    %cst_10 = arith.constant dense<2147483647> : vector<8xi32>
    %41 = vector.multi_reduction <minsi>, %40, %cst_10 [1] : vector<8x18xi32> to vector<8xi32>
    %42 = vector.shape_cast %41 : vector<8xi32> to vector<8x1xi32>
    %43 = vector.broadcast %42 : vector<8x1xi32> to vector<8x18xi32>
    %44 = arith.cmpi eq, %6, %43 : vector<8x18xi32>
    %45 = arith.extui %44 : vector<8x18xi1> to vector<8x18xi32>
    %46 = arith.sitofp %45 : vector<8x18xi32> to vector<8x18xf32>
    %cst_11 = arith.constant dense<0.000000e+00> : vector<8x96xf32>
    %47 = tpu.matmul %46, %5, %cst_11 {dimension_numbers = #tpu.dot_dimension_numbers<[1], [0], [0], [1], [0, 0, 1, 1], [], []>} : vector<8x18xf32>, vector<18x96xf32>, vector<8x96xf32> -> vector<8x96xf32>
    %48 = vector.extract_strided_slice %33 {offsets = [0, 0], sizes = [8, 96], strides = [1, 1]} : vector<8x114xf32> to vector<8x96xf32>
    %49 = vector.extract_strided_slice %47 {offsets = [0, 0], sizes = [8, 64], strides = [1, 1]} : vector<8x96xf32> to vector<8x64xf32>
    %50 = vector.extract_strided_slice %48 {offsets = [0, 0], sizes = [8, 64], strides = [1, 1]} : vector<8x96xf32> to vector<8x64xf32>
    %51 = arith.addf %49, %50 : vector<8x64xf32>
    %52 = arith.negf %51 : vector<8x64xf32>
    %53 = math.exp %52 : vector<8x64xf32>
    %cst_12 = arith.constant 1.000000e+00 : f32
    %54 = vector.broadcast %cst_12 : f32 to vector<8x64xf32>
    %55 = arith.addf %54, %53 : vector<8x64xf32>
    %56 = arith.divf %54, %55 : vector<8x64xf32>
    %57 = vector.extract_strided_slice %56 {offsets = [0, 0], sizes = [8, 32], strides = [1, 1]} : vector<8x64xf32> to vector<8x32xf32>
    %58 = vector.extract_strided_slice %56 {offsets = [0, 32], sizes = [8, 32], strides = [1, 1]} : vector<8x64xf32> to vector<8x32xf32>
    %59 = vector.extract_strided_slice %47 {offsets = [0, 64], sizes = [8, 32], strides = [1, 1]} : vector<8x96xf32> to vector<8x32xf32>
    %60 = vector.extract_strided_slice %48 {offsets = [0, 64], sizes = [8, 32], strides = [1, 1]} : vector<8x96xf32> to vector<8x32xf32>
    %61 = arith.mulf %57, %60 : vector<8x32xf32>
    %62 = arith.addf %59, %61 : vector<8x32xf32>
    %63 = math.tanh %62 : vector<8x32xf32>
    %64 = arith.subf %31, %63 : vector<8x32xf32>
    %65 = arith.mulf %58, %64 : vector<8x32xf32>
    %66 = arith.addf %63, %65 : vector<8x32xf32>
    %cst_13 = arith.constant dense<0.000000e+00> : vector<8x114xf32>
    %67 = tpu.matmul %66, %1, %cst_13 {dimension_numbers = #tpu.dot_dimension_numbers<[1], [0], [0], [1], [0, 0, 1, 1], [], []>} : vector<8x32xf32>, vector<32x114xf32>, vector<8x114xf32> -> vector<8x114xf32>
    %68 = arith.addf %67, %4 : vector<8x114xf32>
    %69 = vector.extract_strided_slice %68 {offsets = [0, 96], sizes = [8, 18], strides = [1, 1]} : vector<8x114xf32> to vector<8x18xf32>
    %cst_14 = arith.constant dense<0xFF800000> : vector<8xf32>
    %70 = vector.multi_reduction <maximumf>, %69, %cst_14 [1] : vector<8x18xf32> to vector<8xf32>
    %71 = vector.shape_cast %70 : vector<8xf32> to vector<8x1xf32>
    %72 = vector.broadcast %71 : vector<8x1xf32> to vector<8x18xf32>
    %73 = arith.cmpf oge, %69, %72 : vector<8x18xf32>
    %c18_i32_15 = arith.constant 18 : i32
    %74 = vector.broadcast %c18_i32_15 : i32 to vector<8x18xi32>
    %75 = arith.select %73, %7, %74 : vector<8x18xi1>, vector<8x18xi32>
    %cst_16 = arith.constant dense<2147483647> : vector<8xi32>
    %76 = vector.multi_reduction <minsi>, %75, %cst_16 [1] : vector<8x18xi32> to vector<8xi32>
    %77 = vector.shape_cast %76 : vector<8xi32> to vector<8x1xi32>
    %78 = vector.broadcast %77 : vector<8x1xi32> to vector<8x18xi32>
    %79 = arith.cmpi eq, %6, %78 : vector<8x18xi32>
    %80 = arith.extui %79 : vector<8x18xi1> to vector<8x18xi32>
    %81 = arith.sitofp %80 : vector<8x18xi32> to vector<8x18xf32>
    %cst_17 = arith.constant dense<0.000000e+00> : vector<8x96xf32>
    %82 = tpu.matmul %81, %5, %cst_17 {dimension_numbers = #tpu.dot_dimension_numbers<[1], [0], [0], [1], [0, 0, 1, 1], [], []>} : vector<8x18xf32>, vector<18x96xf32>, vector<8x96xf32> -> vector<8x96xf32>
    %83 = vector.extract_strided_slice %68 {offsets = [0, 0], sizes = [8, 96], strides = [1, 1]} : vector<8x114xf32> to vector<8x96xf32>
    %84 = vector.extract_strided_slice %82 {offsets = [0, 0], sizes = [8, 64], strides = [1, 1]} : vector<8x96xf32> to vector<8x64xf32>
    %85 = vector.extract_strided_slice %83 {offsets = [0, 0], sizes = [8, 64], strides = [1, 1]} : vector<8x96xf32> to vector<8x64xf32>
    %86 = arith.addf %84, %85 : vector<8x64xf32>
    %87 = arith.negf %86 : vector<8x64xf32>
    %88 = math.exp %87 : vector<8x64xf32>
    %cst_18 = arith.constant 1.000000e+00 : f32
    %89 = vector.broadcast %cst_18 : f32 to vector<8x64xf32>
    %90 = arith.addf %89, %88 : vector<8x64xf32>
    %91 = arith.divf %89, %90 : vector<8x64xf32>
    %92 = vector.extract_strided_slice %91 {offsets = [0, 0], sizes = [8, 32], strides = [1, 1]} : vector<8x64xf32> to vector<8x32xf32>
    %93 = vector.extract_strided_slice %91 {offsets = [0, 32], sizes = [8, 32], strides = [1, 1]} : vector<8x64xf32> to vector<8x32xf32>
    %94 = vector.extract_strided_slice %82 {offsets = [0, 64], sizes = [8, 32], strides = [1, 1]} : vector<8x96xf32> to vector<8x32xf32>
    %95 = vector.extract_strided_slice %83 {offsets = [0, 64], sizes = [8, 32], strides = [1, 1]} : vector<8x96xf32> to vector<8x32xf32>
    %96 = arith.mulf %92, %95 : vector<8x32xf32>
    %97 = arith.addf %94, %96 : vector<8x32xf32>
    %98 = math.tanh %97 : vector<8x32xf32>
    %99 = arith.subf %66, %98 : vector<8x32xf32>
    %100 = arith.mulf %93, %99 : vector<8x32xf32>
    %101 = arith.addf %98, %100 : vector<8x32xf32>
    %cst_19 = arith.constant dense<0.000000e+00> : vector<8x114xf32>
    %102 = tpu.matmul %101, %1, %cst_19 {dimension_numbers = #tpu.dot_dimension_numbers<[1], [0], [0], [1], [0, 0, 1, 1], [], []>} : vector<8x32xf32>, vector<32x114xf32>, vector<8x114xf32> -> vector<8x114xf32>
    %103 = arith.addf %102, %4 : vector<8x114xf32>
    %104 = vector.extract_strided_slice %103 {offsets = [0, 96], sizes = [8, 18], strides = [1, 1]} : vector<8x114xf32> to vector<8x18xf32>
    %cst_20 = arith.constant dense<0xFF800000> : vector<8xf32>
    %105 = vector.multi_reduction <maximumf>, %104, %cst_20 [1] : vector<8x18xf32> to vector<8xf32>
    %106 = vector.shape_cast %105 : vector<8xf32> to vector<8x1xf32>
    %107 = vector.broadcast %106 : vector<8x1xf32> to vector<8x18xf32>
    %108 = arith.cmpf oge, %104, %107 : vector<8x18xf32>
    %c18_i32_21 = arith.constant 18 : i32
    %109 = vector.broadcast %c18_i32_21 : i32 to vector<8x18xi32>
    %110 = arith.select %108, %7, %109 : vector<8x18xi1>, vector<8x18xi32>
    %cst_22 = arith.constant dense<2147483647> : vector<8xi32>
    %111 = vector.multi_reduction <minsi>, %110, %cst_22 [1] : vector<8x18xi32> to vector<8xi32>
    %112 = vector.shape_cast %111 : vector<8xi32> to vector<8x1xi32>
    %113 = vector.broadcast %112 : vector<8x1xi32> to vector<8x18xi32>
    %114 = arith.cmpi eq, %6, %113 : vector<8x18xi32>
    %115 = arith.extui %114 : vector<8x18xi1> to vector<8x18xi32>
    %116 = arith.sitofp %115 : vector<8x18xi32> to vector<8x18xf32>
    %cst_23 = arith.constant dense<0.000000e+00> : vector<8x96xf32>
    %117 = tpu.matmul %116, %5, %cst_23 {dimension_numbers = #tpu.dot_dimension_numbers<[1], [0], [0], [1], [0, 0, 1, 1], [], []>} : vector<8x18xf32>, vector<18x96xf32>, vector<8x96xf32> -> vector<8x96xf32>
    %118 = vector.extract_strided_slice %103 {offsets = [0, 0], sizes = [8, 96], strides = [1, 1]} : vector<8x114xf32> to vector<8x96xf32>
    %119 = vector.extract_strided_slice %117 {offsets = [0, 0], sizes = [8, 64], strides = [1, 1]} : vector<8x96xf32> to vector<8x64xf32>
    %120 = vector.extract_strided_slice %118 {offsets = [0, 0], sizes = [8, 64], strides = [1, 1]} : vector<8x96xf32> to vector<8x64xf32>
    %121 = arith.addf %119, %120 : vector<8x64xf32>
    %122 = arith.negf %121 : vector<8x64xf32>
    %123 = math.exp %122 : vector<8x64xf32>
    %cst_24 = arith.constant 1.000000e+00 : f32
    %124 = vector.broadcast %cst_24 : f32 to vector<8x64xf32>
    %125 = arith.addf %124, %123 : vector<8x64xf32>
    %126 = arith.divf %124, %125 : vector<8x64xf32>
    %127 = vector.extract_strided_slice %126 {offsets = [0, 0], sizes = [8, 32], strides = [1, 1]} : vector<8x64xf32> to vector<8x32xf32>
    %128 = vector.extract_strided_slice %126 {offsets = [0, 32], sizes = [8, 32], strides = [1, 1]} : vector<8x64xf32> to vector<8x32xf32>
    %129 = vector.extract_strided_slice %117 {offsets = [0, 64], sizes = [8, 32], strides = [1, 1]} : vector<8x96xf32> to vector<8x32xf32>
    %130 = vector.extract_strided_slice %118 {offsets = [0, 64], sizes = [8, 32], strides = [1, 1]} : vector<8x96xf32> to vector<8x32xf32>
    %131 = arith.mulf %127, %130 : vector<8x32xf32>
    %132 = arith.addf %129, %131 : vector<8x32xf32>
    %133 = math.tanh %132 : vector<8x32xf32>
    %134 = arith.subf %101, %133 : vector<8x32xf32>
    %135 = arith.mulf %128, %134 : vector<8x32xf32>
    %136 = arith.addf %133, %135 : vector<8x32xf32>
    %cst_25 = arith.constant dense<0.000000e+00> : vector<8x114xf32>
    %137 = tpu.matmul %136, %1, %cst_25 {dimension_numbers = #tpu.dot_dimension_numbers<[1], [0], [0], [1], [0, 0, 1, 1], [], []>} : vector<8x32xf32>, vector<32x114xf32>, vector<8x114xf32> -> vector<8x114xf32>
    %138 = arith.addf %137, %4 : vector<8x114xf32>
    %139 = vector.extract_strided_slice %138 {offsets = [0, 96], sizes = [8, 18], strides = [1, 1]} : vector<8x114xf32> to vector<8x18xf32>
    %cst_26 = arith.constant dense<0xFF800000> : vector<8xf32>
    %140 = vector.multi_reduction <maximumf>, %139, %cst_26 [1] : vector<8x18xf32> to vector<8xf32>
    %141 = vector.shape_cast %140 : vector<8xf32> to vector<8x1xf32>
    %c0_27 = arith.constant 0 : index
    %c0_28 = arith.constant 0 : index
    %142 = vector.load %arg5[%c0_27, %c0_28] : memref<8x32xf32, #tpu.memory_space<vmem>>, vector<8x32xf32>
    tpu.vector_store %arg5[%c0_27, %c0_28], %136 {strides = array<i32>} : memref<8x32xf32, #tpu.memory_space<vmem>>, vector<8x32xf32>,
    %143 = vector.broadcast %36 : vector<8x1xf32> to vector<8x18xf32>
    %144 = arith.subf %34, %143 : vector<8x18xf32>
    %145 = math.exp %144 : vector<8x18xf32>
    %cst_29 = arith.constant dense<0.000000e+00> : vector<8xf32>
    %146 = vector.multi_reduction <add>, %145, %cst_29 [1] : vector<8x18xf32> to vector<8xf32>
    %147 = vector.shape_cast %146 : vector<8xf32> to vector<8x1xf32>
    %148 = math.log %147 : vector<8x1xf32>
    %149 = arith.addf %148, %36 : vector<8x1xf32>
    %150 = vector.broadcast %149 : vector<8x1xf32> to vector<8x18xf32>
    %151 = arith.subf %34, %150 : vector<8x18xf32>
    %152 = vector.broadcast %71 : vector<8x1xf32> to vector<8x18xf32>
    %153 = arith.subf %69, %152 : vector<8x18xf32>
    %154 = math.exp %153 : vector<8x18xf32>
    %cst_30 = arith.constant dense<0.000000e+00> : vector<8xf32>
    %155 = vector.multi_reduction <add>, %154, %cst_30 [1] : vector<8x18xf32> to vector<8xf32>
    %156 = vector.shape_cast %155 : vector<8xf32> to vector<8x1xf32>
    %157 = math.log %156 : vector<8x1xf32>
    %158 = arith.addf %157, %71 : vector<8x1xf32>
    %159 = vector.broadcast %158 : vector<8x1xf32> to vector<8x18xf32>
    %160 = arith.subf %69, %159 : vector<8x18xf32>
    %161 = vector.broadcast %106 : vector<8x1xf32> to vector<8x18xf32>
    %162 = arith.subf %104, %161 : vector<8x18xf32>
    %163 = math.exp %162 : vector<8x18xf32>
    %cst_31 = arith.constant dense<0.000000e+00> : vector<8xf32>
    %164 = vector.multi_reduction <add>, %163, %cst_31 [1] : vector<8x18xf32> to vector<8xf32>
    %165 = vector.shape_cast %164 : vector<8xf32> to vector<8x1xf32>
    %166 = math.log %165 : vector<8x1xf32>
    %167 = arith.addf %166, %106 : vector<8x1xf32>
    %168 = vector.broadcast %167 : vector<8x1xf32> to vector<8x18xf32>
    %169 = arith.subf %104, %168 : vector<8x18xf32>
    %170 = vector.broadcast %141 : vector<8x1xf32> to vector<8x18xf32>
    %171 = arith.subf %139, %170 : vector<8x18xf32>
    %172 = math.exp %171 : vector<8x18xf32>
    %cst_32 = arith.constant dense<0.000000e+00> : vector<8xf32>
    %173 = vector.multi_reduction <add>, %172, %cst_32 [1] : vector<8x18xf32> to vector<8xf32>
    %174 = vector.shape_cast %173 : vector<8xf32> to vector<8x1xf32>
    %175 = math.log %174 : vector<8x1xf32>
    %176 = arith.addf %175, %141 : vector<8x1xf32>
    %177 = vector.broadcast %176 : vector<8x1xf32> to vector<8x18xf32>
    %178 = arith.subf %139, %177 : vector<8x18xf32>
    %179 = tpu.concatenate %151, %160, %169, %178 in 1 : vector<8x18xf32>, vector<8x18xf32>, vector<8x18xf32>, vector<8x18xf32> -> vector<8x72xf32>
    %c0_33 = arith.constant 0 : index
    %c0_34 = arith.constant 0 : index
    %180 = vector.load %arg4[%c0_33, %c0_34] : memref<8x72xf32, #tpu.memory_space<vmem>>, vector<8x72xf32>
    tpu.vector_store %arg4[%c0_33, %c0_34], %179 {strides = array<i32>} : memref<8x72xf32, #tpu.memory_space<vmem>>, vector<8x72xf32>,
    return
  }
}

</mosaic_0001>

<bundles_post_ra>
// kernel: decoder_forward.1
= control target key start
LH: loop header
LB: loop body
LE: loop exit
PB: predicated region body
PF: predicated region fallthrough
CT: control target
= control target key end

     0   :  { %11 = vsyncpa [#allocation3], 0  ;;  %s1522_s0 = inlined_call_operand.hbm [shape: f32[8,32], index: 0, kind: input, shape index: {}]   ;;  %s1523_s1 = inlined_call_operand.hbm [shape: f32[18,96], index: 1, kind: input, shape index: {}]   ;;  %s1524_s2 = inlined_call_operand.hbm [shape: f32[32,114], index: 2, kind: input, shape index: {}]   ;;  %s1525_s3 = inlined_call_operand.vmem [shape: f32[1,114], index: 3, kind: input, shape index: {}]   ;;  %s1526_s4 = inlined_call_operand.vmem [shape: f32[8,72], index: 4, kind: output, shape index: {0}]   ;;  %s1527_s5 = inlined_call_operand.hbm [shape: f32[8,32], index: 5, kind: output, shape index: {1}]  }
   0x1   :  { %12 = vsyncpa [#allocation6], 0 }
   0x2   :  { %13 = vsyncpa [#allocation4], 0  ;;  %s1252_s18 = smov [#allocation5]  }
   0x3   :  { %s29_s19 = sshll.u32 %s1252_s18, 4  ;;  %s30_s19 = int_to_ptr.vmem [resolvable:$true] %s29_s19 }
   0x4   :  { %s1174_s20 = scalar_lea.vmem %s30_s19, 384  ;;  %p1179_p1 = scmp.lt.s32.totalorder %s30_s19, %s30_s19 }
   0x5   :  { %p1175_p0 = scmp.ne.s32.totalorder %s30_s19, %s1174_s20  ;;  %p1180_p2 = scmp.lt.s32.totalorder %s1174_s20, %s1174_s20 }
   0x7   :  { %p1181_p3 = por %p1180_p2, %p1179_p1 }
   0x9   :  { %p1182_p4 = pnand %p1181_p3, %p1175_p0 }
   0xb   :  { %1185 = shalt.err (!%p1182_p4)
}
   0xc   :  { %s1253_s21 = smov 128   ;;  %s1254_s22 = smov 8  }
   0xd   :  { %35 = dma.hbm_to_vmem [thread:$0]  %s1523_s1, 384, %s30_s19, [#allocation6], %s1253_s21, %s1253_s21, %s1254_s22  }
   0xe   :  { %s1255_s25 = smov [#allocation2]   ;;  %s1256_s27 = smov [#allocation7]  }
   0xf   :  { %s20_s26 = sshll.u32 %s1255_s25, 4  ;;  %s41_s28 = sshll.u32 %s1256_s27, 4  ;;  %s21_s26 = int_to_ptr.vmem [resolvable:$true] %s20_s26  ;;  %s42_s28 = int_to_ptr.vmem [resolvable:$true] %s41_s28 }
  0x10   :  { %s1194_s29 = scalar_lea.vmem %s21_s26, 128  ;;  %p1199_p6 = scmp.lt.s32.totalorder %s21_s26, %s21_s26 }
  0x11   :  { %p1195_p5 = scmp.ne.s32.totalorder %s21_s26, %s1194_s29  ;;  %p1200_p7 = scmp.lt.s32.totalorder %s1194_s29, %s1194_s29 }
  0x13   :  { %p1201_p8 = por %p1200_p7, %p1199_p6 }
  0x15   :  { %p1202_p9 = pnand %p1201_p8, %p1195_p5 }
  0x17   :  { %1205 = shalt.err (!%p1202_p9)
}
  0x18   :  { %23 = dma.hbm_to_vmem [thread:$0]  %s1522_s0, 128, %s21_s26, [#allocation3]  }
  0x19   :  { %s1214_s7 = scalar_lea.vmem %s42_s28, 512  ;;  %p1219_p11 = scmp.lt.s32.totalorder %s42_s28, %s42_s28 }
  0x1a   :  { %p1215_p10 = scmp.ne.s32.totalorder %s42_s28, %s1214_s7  ;;  %p1220_p12 = scmp.lt.s32.totalorder %s1214_s7, %s1214_s7 }
  0x1c   :  { %p1221_p13 = por %p1220_p12, %p1219_p11 }
  0x1e   :  { %p1222_p0 = pnand %p1221_p13, %p1215_p10 }
  0x20   :  { %1225 = shalt.err (!%p1222_p0)
}
  0x21   :  { %47 = dma.hbm_to_vmem [thread:$0]  %s1524_s2, 512, %s42_s28, [#allocation6], %s1253_s21, %s1253_s21, %s1254_s22  }
  0x22   :  { %1246 = dma.done.wait [#allocation3], 128  }
  0x23   :  { %1247 = vsyncadd [#allocation3], 4294967168 }
  0x24   :  { %1248 = dma.done.wait [#allocation6], 896  }
  0x25   :  { %1249 = vsyncadd [#allocation6], 4294966400  ;;  %v1257_v0 = vmov 0.0   ;;  %vm1258_vm0 = vmmov 0   ;;  %v1311_v1 = vld [vmem:[#allocation7 + $0x18] sm:$0xff]  ;;  %v1313_v2 = vld [vmem:[#allocation7 + $0x10] sm:$0xff]  ;;  %v74_v10 = vlaneseq }
  0x26   :  { %1030 = vmatprep.subr.mxu0 %v1257_v0  ;;  %1038 = vmatprep.mubr.msk.f32.mxu0 %vm1258_vm0, %v1257_v0  ;;  %v1318_v3 = vld [vmem:[#allocation7 + $0x8] sm:$0xff]  ;;  %v1324_v4 = vld [vmem:[#allocation7] sm:$0xff]  ;;  %vm76_vm1 = vcmask 261120   ;;  %s1259_s9 = smov 64   ;;  %s1261_s10 = smov 96   ;;  %vm262_vm2 = vcmask 933632  }
  0x27   :  { %1041 = vmatprep.subr.mxu1 %v1257_v0  ;;  %1049 = vmatprep.mubr.msk.f32.mxu1 %vm1258_vm0, %v1257_v0  ;;  %v59_v5 = vld [vmem:[#allocation2] sm:$0xff]  ;;  %v151_v11 = vshrl.u32 %v74_v10, 7  ;;  %v1345_v13 = vld [vmem:[#allocation5] sm:$0xff]  ;;  %v1367_v32 = vand.u32 127, %v74_v10  ;;  %v1384_v47 = vld [vmem:[#allocation5 + $0x10] sm:$0x3] }
  0x28   :  { %1031 = vmatpush3.msra.mxu0 %v1311_v1  ;;  %1042 = vmatpush3.msra.mxu1 %v1311_v1  ;;  %v1341_v6 = vld [vmem:[%s1525_s3] ss:$0 sm:$0xff]  ;;  %s1260_s3 = smov 32   ;;  %vm292_vm5 = vcmask 1041408   ;;  %v1389_v48 = vld [vmem:[#allocation5 + $0x8] sm:$0xff]  ;;  %vm288_vm6 = vcmask 146432  }
  0x29   :  { %1032 = vmatprep.subr.mxu0 %v1257_v0  ;;  %1043 = vmatprep.subr.mxu1 %v1257_v0  ;;  %v152_v12 = vsub.s32 0, %v151_v11  ;;  %s1262_s11 = smov 50   ;;  %s1263_s12 = smov 68  }
  0x2a   :  { %1033 = vmatpush3.msra.mxu0 %v1313_v2  ;;  %1044 = vmatpush3.msra.mxu1 %v1313_v2  ;;  %s1264_s13 = smov [#allocation8]  }
  0x2b   :  { %1034 = vmatprep.subr.mxu0 %v1257_v0  ;;  %1045 = vmatprep.subr.mxu1 %v1257_v0  ;;  %v153_v14 = vrot.slane %v1345_v13, %v152_v12  ;;  %s962_s14 = sshll.u32 %s1264_s13, 4  ;;  %s963_s14 = int_to_ptr.vmem [resolvable:$true] %s962_s14 }
  0x2c   :  { %1035 = vmatpush3.msra.mxu0 %v1318_v3  ;;  %1046 = vmatpush3.msra.mxu1 %v1318_v3  ;;  %s1226_s15 = scalar_lea.vmem %s963_s14, 128  ;;  %p1231_p2 = scmp.lt.s32.totalorder %s963_s14, %s963_s14 }
  0x2d   :  { %1036 = vmatprep.subr.mxu0 %v1257_v0  ;;  %1047 = vmatprep.subr.mxu1 %v1257_v0  ;;  %p1227_p1 = scmp.ne.s32.totalorder %s963_s14, %s1226_s15  ;;  %p1232_p3 = scmp.lt.s32.totalorder %s1226_s15, %s1226_s15 }
  0x2e   :  { %1037 = vmatpush3.msra.mxu0 %v1324_v4  ;;  %1048 = vmatpush3.msra.mxu1 %v1324_v4 }
  0x2f   :  { %1039 = vmatmul.mubr.msk.f32.vlgmr.msra.gmra.mxu0 %vm76_vm1, %v59_v5  ;;  %1052 = vmatprep.subr.mxu0 %v1257_v0  ;;  %p1233_p4 = por %p1232_p3, %p1231_p2 }
  0x30   :  { %1058 = vmatprep.mubr.msk.f32.mxu0 %vm1258_vm0, %v1257_v0  ;;  %1061 = vmatprep.subr.mxu1 %v1257_v0 }
  0x31   :  { %1053 = vmatpush3.msk.msra.mxu0 %vm292_vm5, %v1384_v47  ;;  %p1234_p5 = pnand %p1233_p4, %p1227_p1 }
  0x32   :  { %1054 = vmatprep.subr.mxu0 %v1257_v0 }
  0x33   :  { %1055 = vmatpush3.msra.mxu0 %v1389_v48 }
  0x34   :  { %1056 = vmatprep.subr.mxu0 %v1257_v0 }
  0x35   :  { %1057 = vmatpush3.msra.mxu0 %v1345_v13 }
  0x36   :  { %1072 = vmatprep.subr.mxu0 %v1257_v0 }
  0xef   :  { %v146_v7 = vpop.f32.mrf.mxu0 }
  0xf0   :  { %v147_v8 = vadd.f32 %v1341_v6, %v146_v7 }
  0xf1   :  { %v1040_v9 = vpop.f32.mrf.mxu0 }
  0xf2   :  { %162 = vrot.lane.b32.xlu0 %v147_v8, %s1259_s9  ;;  %v154_v15 = vadd.f32 %v153_v14, %v147_v8 }
  0xf4   :  { %v976_v16 = vmul.f32 -1.442695, %v154_v15 }
  0xf6   :  { %1126 = vpow2.f32 %v976_v16 }
 0x103   :  { %v1127_v17 = vpop.eup %1126 }
 0x104   :  { %v158_v18 = vadd.f32 1.0, %v1127_v17 }
 0x106   :  { %1128 = vrcp.f32 %v158_v18 }
 0x113   :  { %v1129_v19 = vpop.eup %1128 }
 0x164   :  { %v163_v20 = vpop.permute.xlu0 %162 }
 0x165   :  { %v165_v21 = vmul.f32 %v1129_v19, %v163_v20 }
 0x167   :  { %167 = vrot.lane.b32.xlu0 %v165_v21, %s1259_s9 }
 0x1d9   :  { %v168_v22 = vpop.permute.xlu0 %167 }
 0x1da   :  { %v170_v23 = vadd.f32 %v168_v22, %v153_v14 }
 0x1dc   :  { %1130 = vtanh.f32 %v170_v23 }
 0x1e9   :  { %v1131_v24 = vpop.eup %1130 }
 0x1ea   :  { %173 = vrot.lane.b32.xlu1 %v1131_v24, %s1259_s9 }
 0x25c   :  { %v174_v25 = vpop.permute.xlu1 %173 }
 0x25d   :  { %v176_v26 = vsub.f32 %v59_v5, %v174_v25 }
 0x25f   :  { %178 = vrot.lane.b32.xlu1 %v176_v26, %s1260_s3 }
 0x2d1   :  { %v179_v27 = vpop.permute.xlu1 %178 }
 0x2d2   :  { %v181_v28 = vmul.f32 %v1129_v19, %v179_v27 }
 0x2d4   :  { %183 = vrot.lane.b32.xlu0 %v181_v28, %s1260_s3 }
 0x346   :  { %v184_v29 = vpop.permute.xlu0 %183 }
 0x347   :  { %v1352_v30 = vadd.f32 %v1131_v24, %v184_v29 }
 0x349   :  { %188 = vrot.lane.b32.xlu1 %v1352_v30, %s1259_s9 }
 0x34d   :  { %267 = vrot.lane.b32.xlu1 %v1367_v32, %s1261_s10 }
 0x3bb   :  { %v189_v31 = vpop.permute.xlu1 %188 }
 0x3bc   :  { %1050 = vmatmul.mubr.msk.f32.vlgmr.msra.gmra.mxu1 %vm76_vm1, %v189_v31 }
 0x3bd   :  { %1062 = vmatpush3.msra.mxu1 %v1311_v1  ;;  %1069 = vmatprep.mubr.msk.f32.mxu1 %vm1258_vm0, %v1257_v0 }
 0x3be   :  { %1063 = vmatprep.subr.mxu1 %v1257_v0 }
 0x3bf   :  { %1064 = vmatpush3.msra.mxu1 %v1313_v2  ;;  %v1376_v37 = vpop.permute.xlu1 %267 }
 0x3c0   :  { %1065 = vmatprep.subr.mxu1 %v1257_v0 }
 0x3c1   :  { %1066 = vmatpush3.msra.mxu1 %v1318_v3 }
 0x3c2   :  { %1067 = vmatprep.subr.mxu1 %v1257_v0 }
 0x3c3   :  { %1068 = vmatpush3.msra.mxu1 %v1324_v4 }
 0x3c4   :  { %1081 = vmatprep.subr.mxu1 %v1257_v0 }
 0x47c   :  { %v258_v33 = vpop.f32.mrf.mxu1 }
 0x47d   :  { %v1372_v34 = vadd.f32 %v1341_v6, %v258_v33 }
 0x47e   :  { %v1051_v35 = vpop.f32.mrf.mxu1 }
 0x47f   :  { %v263_v36 = vsel %vm262_vm2, %v1372_v34, -inf }
 0x480   :  { %264 = vmax.xlane.f32.xlu0 %v263_v36 }
 0x509   :  { %v1378_v38 = vpop.xlane.xlu0 %264 }
 0x50a   :  { %vm266_vm3 = vcmp.ge.f32.partialorder %v1372_v34, %v1378_v38 }
 0x50b   :  { %v269_v39 = vsel %vm266_vm3, %v1376_v37, 18 }
 0x50c   :  { %v270_v40 = vsel %vm262_vm2, %v269_v39, 2147483647 }
 0x50d   :  { %v272_v41 = vshra.s32 %v270_v40, 16  ;;  %v271_v43 = vand.u32 65535, %v270_v40 }
 0x50f   :  { %v274_v42 = vcvt.s32.f32 %v272_v41  ;;  %v273_v45 = vcvt.s32.f32 %v271_v43 }
 0x511   :  { %275 = vmin.xlane.f32.xlu1 %v274_v42 }
 0x59a   :  { %v276_v44 = vpop.xlane.xlu1 %275 }
 0x59b   :  { %vm277_vm4 = vcmp.eq.f32.partialorder %v274_v42, %v276_v44  ;;  %v282_v49 = vcvt.f32.s32 %v276_v44 }
 0x59c   :  { %v278_v46 = vsel %vm277_vm4, %v273_v45, inf }
 0x59d   :  { %279 = vmin.xlane.f32.xlu0 %v278_v46  ;;  %v283_v51 = vshll.u32 %v282_v49, 16 }
 0x5b3   :  { %374 = vrot.lane.b32.xlu0 %v1372_v34, %s1259_s9 }
 0x626   :  { %v280_v50 = vpop.xlane.xlu0 %279 }
 0x627   :  { %v281_v52 = vcvt.f32.s32 %v280_v50 }
 0x629   :  { %v284_v53 = vadd.s32 %v283_v51, %v281_v52 }
 0x62a   :  { %v375_v62 = vpop.permute.xlu0 %374 }
 0x62b   :  { %vm285_vm7 = vcmp.eq.s32.totalorder %v1367_v32, %v284_v53 }
 0x62c   :  { %v978_v54 = vsel %vm285_vm7, 1.0, %v1257_v0 }
 0x62d   :  { %1059 = vmatmul.mubr.msk.f32.vlgmr.msra.gmra.mxu0 %vm288_vm6, %v978_v54 }
 0x62e   :  { %1073 = vmatpush3.msk.msra.mxu0 %vm292_vm5, %v1384_v47  ;;  %1078 = vmatprep.mubr.msk.f32.mxu0 %vm1258_vm0, %v1257_v0 }
 0x62f   :  { %1074 = vmatprep.subr.mxu0 %v1257_v0 }
 0x630   :  { %1075 = vmatpush3.msra.mxu0 %v1389_v48 }
 0x631   :  { %1076 = vmatprep.subr.mxu0 %v1257_v0 }
 0x632   :  { %1077 = vmatpush3.msra.mxu0 %v1345_v13 }
 0x633   :  { %1092 = vmatprep.subr.mxu0 %v1257_v0 }
 0x6ed   :  { %v362_v55 = vpop.f32.mrf.mxu0 }
 0x6ee   :  { %v366_v56 = vadd.f32 %v362_v55, %v1372_v34 }
 0x6ef   :  { %v1060_v57 = vpop.f32.mrf.mxu0 }
 0x6f0   :  { %v981_v58 = vmul.f32 -1.442695, %v366_v56 }
 0x6f2   :  { %1132 = vpow2.f32 %v981_v58 }
 0x6ff   :  { %v1133_v59 = vpop.eup %1132 }
 0x700   :  { %v370_v60 = vadd.f32 1.0, %v1133_v59 }
 0x702   :  { %1134 = vrcp.f32 %v370_v60 }
 0x70f   :  { %v1135_v61 = vpop.eup %1134 }
 0x710   :  { %v377_v63 = vmul.f32 %v1135_v61, %v375_v62 }
 0x712   :  { %379 = vrot.lane.b32.xlu1 %v377_v63, %s1259_s9 }
 0x784   :  { %v380_v5 = vpop.permute.xlu1 %379 }
 0x785   :  { %v382_v7 = vadd.f32 %v380_v5, %v362_v55 }
 0x787   :  { %1136 = vtanh.f32 %v382_v7 }
 0x794   :  { %v1137_v8 = vpop.eup %1136 }
 0x795   :  { %v384_v9 = vsub.f32 %v1352_v30, %v1137_v8 }
 0x797   :  { %386 = vrot.lane.b32.xlu0 %v384_v9, %s1261_s10 }
 0x809   :  { %v387_v10 = vpop.permute.xlu0 %386 }
 0x80a   :  { %v389_v11 = vmul.f32 %v1135_v61, %v387_v10 }
 0x80c   :  { %391 = vrot.lane.b32.xlu1 %v389_v11, %s1260_s3 }
 0x87e   :  { %v392_v12 = vpop.permute.xlu1 %391 }
 0x87f   :  { %v1414_v14 = vadd.f32 %v1137_v8, %v392_v12 }
 0x881   :  { %396 = vrot.lane.b32.xlu0 %v1414_v14, %s1259_s9 }
 0x8f3   :  { %v397_v15 = vpop.permute.xlu0 %396 }
 0x8f4   :  { %1070 = vmatmul.mubr.msk.f32.vlgmr.msra.gmra.mxu1 %vm76_vm1, %v397_v15 }
 0x8f5   :  { %1082 = vmatpush3.msra.mxu1 %v1311_v1  ;;  %1089 = vmatprep.mubr.msk.f32.mxu1 %vm1258_vm0, %v1257_v0 }
 0x8f6   :  { %1083 = vmatprep.subr.mxu1 %v1257_v0 }
 0x8f7   :  { %1084 = vmatpush3.msra.mxu1 %v1313_v2 }
 0x8f8   :  { %1085 = vmatprep.subr.mxu1 %v1257_v0 }
 0x8f9   :  { %1086 = vmatpush3.msra.mxu1 %v1318_v3 }
 0x8fa   :  { %1087 = vmatprep.subr.mxu1 %v1257_v0 }
 0x8fb   :  { %1088 = vmatpush3.msra.mxu1 %v1324_v4 }
 0x8fc   :  { %1101 = vmatprep.subr.mxu1 %v1257_v0 }
 0x9b4   :  { %v466_v16 = vpop.f32.mrf.mxu1 }
 0x9b5   :  { %v1430_v17 = vadd.f32 %v1341_v6, %v466_v16 }
 0x9b6   :  { %v1071_v18 = vpop.f32.mrf.mxu1 }
 0x9b7   :  { %v470_v19 = vsel %vm262_vm2, %v1430_v17, -inf }
 0x9b8   :  { %471 = vmax.xlane.f32.xlu1 %v470_v19 }
 0x9c9   :  { %574 = vrot.lane.b32.xlu1 %v1430_v17, %s1259_s9 }
 0xa41   :  { %v1436_v20 = vpop.xlane.xlu1 %471 }
 0xa42   :  { %vm473_vm8 = vcmp.ge.f32.partialorder %v1430_v17, %v1436_v20 }
 0xa43   :  { %v474_v21 = vsel %vm473_vm8, %v1376_v37, 18 }
 0xa44   :  { %v475_v22 = vsel %vm262_vm2, %v474_v21, 2147483647 }
 0xa45   :  { %v477_v23 = vshra.s32 %v475_v22, 16  ;;  %v476_v25 = vand.u32 65535, %v475_v22  ;;  %v575_v46 = vpop.permute.xlu1 %574 }
 0xa47   :  { %v479_v24 = vcvt.s32.f32 %v477_v23  ;;  %v478_v27 = vcvt.s32.f32 %v476_v25 }
 0xa49   :  { %480 = vmin.xlane.f32.xlu0 %v479_v24 }
 0xad2   :  { %v481_v26 = vpop.xlane.xlu0 %480 }
 0xad3   :  { %vm482_vm9 = vcmp.eq.f32.partialorder %v479_v24, %v481_v26  ;;  %v487_v29 = vcvt.f32.s32 %v481_v26 }
 0xad4   :  { %v483_v28 = vsel %vm482_vm9, %v478_v27, inf }
 0xad5   :  { %484 = vmin.xlane.f32.xlu0 %v483_v28  ;;  %v488_v31 = vshll.u32 %v487_v29, 16  ;;  %v875_v28 = vsub.f32 %v1372_v34, %v1378_v38 }
 0xad7   :  { %v876_v29 = vmul.f32 1.442695, %v875_v28 }
 0xb5e   :  { %v485_v30 = vpop.xlane.xlu0 %484 }
 0xb5f   :  { %v486_v33 = vcvt.f32.s32 %v485_v30  ;;  %v889_v30 = vsub.f32 %v1430_v17, %v1436_v20 }
 0xb61   :  { %v489_v35 = vadd.s32 %v488_v31, %v486_v33  ;;  %v890_v31 = vmul.f32 1.442695, %v889_v30 }
 0xb63   :  { %vm490_vm10 = vcmp.eq.s32.totalorder %v1367_v32, %v489_v35 }
 0xb64   :  { %v983_v36 = vsel %vm490_vm10, 1.0, %v1257_v0 }
 0xb65   :  { %1079 = vmatmul.mubr.msk.f32.vlgmr.msra.gmra.mxu0 %vm288_vm6, %v983_v36 }
 0xb66   :  { %1093 = vmatpush3.msk.msra.mxu0 %vm292_vm5, %v1384_v47  ;;  %1098 = vmatprep.mubr.msk.f32.mxu0 %vm1258_vm0, %v1257_v0 }
 0xb67   :  { %1094 = vmatprep.subr.mxu0 %v1257_v0 }
 0xb68   :  { %1095 = vmatpush3.msra.mxu0 %v1389_v48 }
 0xb69   :  { %1096 = vmatprep.subr.mxu0 %v1257_v0 }
 0xb6a   :  { %1097 = vmatpush3.msra.mxu0 %v1345_v13 }
 0xc25   :  { %v562_v39 = vpop.f32.mrf.mxu0 }
 0xc26   :  { %v566_v40 = vadd.f32 %v562_v39, %v1430_v17 }
 0xc27   :  { %v1080_v41 = vpop.f32.mrf.mxu0 }
 0xc28   :  { %v986_v42 = vmul.f32 -1.442695, %v566_v40 }
 0xc2a   :  { %1138 = vpow2.f32 %v986_v42 }
 0xc37   :  { %v1139_v43 = vpop.eup %1138 }
 0xc38   :  { %v570_v44 = vadd.f32 1.0, %v1139_v43 }
 0xc3a   :  { %1140 = vrcp.f32 %v570_v44 }
 0xc47   :  { %v1141_v45 = vpop.eup %1140 }
 0xc48   :  { %v577_v47 = vmul.f32 %v1141_v45, %v575_v46 }
 0xc4a   :  { %579 = vrot.lane.b32.xlu0 %v577_v47, %s1259_s9 }
 0xcbc   :  { %v580_v49 = vpop.permute.xlu0 %579 }
 0xcbd   :  { %v582_v48 = vadd.f32 %v580_v49, %v562_v39 }
 0xcbf   :  { %1142 = vtanh.f32 %v582_v48 }
 0xccc   :  { %v1143_v50 = vpop.eup %1142 }
 0xccd   :  { %v584_v13 = vsub.f32 %v1414_v14, %v1143_v50 }
 0xccf   :  { %586 = vrot.lane.b32.xlu1 %v584_v13, %s1261_s10 }
 0xd41   :  { %v587_v51 = vpop.permute.xlu1 %586 }
 0xd42   :  { %v589_v52 = vmul.f32 %v1141_v45, %v587_v51 }
 0xd44   :  { %591 = vrot.lane.b32.xlu1 %v589_v52, %s1260_s3 }
 0xdb6   :  { %v592_v53 = vpop.permute.xlu1 %591 }
 0xdb7   :  { %v594_v54 = vadd.f32 %v1143_v50, %v592_v53 }
 0xdb9   :  { %596 = vrot.lane.b32.xlu0 %v594_v54, %s1259_s9 }
 0xe2b   :  { %v597_v55 = vpop.permute.xlu0 %596 }
 0xe2c   :  { %1090 = vmatmul.mubr.msk.f32.vlgmr.msra.gmra.mxu1 %vm76_vm1, %v597_v55 }
 0xe2d   :  { %1102 = vmatpush3.msra.mxu1 %v1311_v1  ;;  %1109 = vmatprep.mubr.msk.f32.mxu1 %vm1258_vm0, %v1257_v0 }
 0xe2e   :  { %1103 = vmatprep.subr.mxu1 %v1257_v0 }
 0xe2f   :  { %1104 = vmatpush3.msra.mxu1 %v1313_v2 }
 0xe30   :  { %1105 = vmatprep.subr.mxu1 %v1257_v0 }
 0xe31   :  { %1106 = vmatpush3.msra.mxu1 %v1318_v3 }
 0xe32   :  { %1107 = vmatprep.subr.mxu1 %v1257_v0 }
 0xe33   :  { %1108 = vmatpush3.msra.mxu1 %v1324_v4 }
 0xeec   :  { %v666_v56 = vpop.f32.mrf.mxu1 }
 0xeed   :  { %v1470_v57 = vadd.f32 %v1341_v6, %v666_v56 }
 0xeee   :  { %v1091_v1 = vpop.f32.mrf.mxu1 }
 0xeef   :  { %v670_v58 = vsel %vm262_vm2, %v1470_v57, -inf }
 0xef0   :  { %671 = vmax.xlane.f32.xlu1 %v670_v58 }
 0xf01   :  { %774 = vrot.lane.b32.xlu1 %v1470_v57, %s1259_s9 }
 0xf79   :  { %v1476_v2 = vpop.xlane.xlu1 %671 }
 0xf7a   :  { %vm673_vm11 = vcmp.ge.f32.partialorder %v1470_v57, %v1476_v2  ;;  %v903_v33 = vsub.f32 %v1470_v57, %v1476_v2 }
 0xf7b   :  { %v674_v3 = vsel %vm673_vm11, %v1376_v37, 18 }
 0xf7c   :  { %v675_v4 = vsel %vm262_vm2, %v674_v3, 2147483647  ;;  %v904_v35 = vmul.f32 1.442695, %v903_v33 }
 0xf7d   :  { %v677_v59 = vshra.s32 %v675_v4, 16  ;;  %v676_v61 = vand.u32 65535, %v675_v4  ;;  %v775_v22 = vpop.permute.xlu1 %774 }
 0xf7f   :  { %v679_v60 = vcvt.s32.f32 %v677_v59  ;;  %v678_v63 = vcvt.s32.f32 %v676_v61 }
 0xf81   :  { %680 = vmin.xlane.f32.xlu0 %v679_v60 }
0x100a   :  { %v681_v62 = vpop.xlane.xlu0 %680 }
0x100b   :  { %vm682_vm12 = vcmp.eq.f32.partialorder %v679_v60, %v681_v62  ;;  %v687_v7 = vcvt.f32.s32 %v681_v62 }
0x100c   :  { %v683_v5 = vsel %vm682_vm12, %v678_v63, inf }
0x100d   :  { %684 = vmin.xlane.f32.xlu0 %v683_v5  ;;  %v688_v9 = vshll.u32 %v687_v7, 16 }
0x1096   :  { %v685_v8 = vpop.xlane.xlu0 %684 }
0x1097   :  { %v686_v10 = vcvt.f32.s32 %v685_v8 }
0x1099   :  { %v689_v11 = vadd.s32 %v688_v9, %v686_v10 }
0x109b   :  { %vm690_vm13 = vcmp.eq.s32.totalorder %v1367_v32, %v689_v11 }
0x109c   :  { %v988_v37 = vsel %vm690_vm13, 1.0, %v1257_v0 }
0x109d   :  { %1099 = vmatmul.mubr.msk.f32.vlgmr.msra.gmra.mxu0 %vm288_vm6, %v988_v37 }
0x115d   :  { %v762_v12 = vpop.f32.mrf.mxu0 }
0x115e   :  { %v766_v14 = vadd.f32 %v762_v12, %v1470_v57 }
0x115f   :  { %v1100_v15 = vpop.f32.mrf.mxu0 }
0x1160   :  { %v991_v16 = vmul.f32 -1.442695, %v766_v14 }
0x1162   :  { %1144 = vpow2.f32 %v991_v16 }
0x116f   :  { %v1145_v18 = vpop.eup %1144 }
0x1170   :  { %v770_v19 = vadd.f32 1.0, %v1145_v18 }
0x1172   :  { %1146 = vrcp.f32 %v770_v19 }
0x117f   :  { %v1147_v21 = vpop.eup %1146 }
0x1180   :  { %v777_v23 = vmul.f32 %v1147_v21, %v775_v22 }
0x1182   :  { %779 = vrot.lane.b32.xlu0 %v777_v23, %s1259_s9 }
0x11f4   :  { %v780_v24 = vpop.permute.xlu0 %779 }
0x11f5   :  { %v782_v32 = vadd.f32 %v780_v24, %v762_v12 }
0x11f7   :  { %1148 = vtanh.f32 %v782_v32 }
0x11f8   :  { %1150 = vpow2.f32 %v876_v29 }
0x11f9   :  { %1152 = vpow2.f32 %v890_v31 }
0x11fa   :  { %1154 = vpow2.f32 %v904_v35 }
0x1204   :  { %v1149_v0 = vpop.eup %1148 }
0x1205   :  { %v784_v25 = vsub.f32 %v594_v54, %v1149_v0  ;;  %v1151_v40 = vpop.eup %1150 }
0x1206   :  { %v1153_v41 = vpop.eup %1152 }
0x1207   :  { %786 = vrot.lane.b32.xlu1 %v784_v25, %s1261_s10  ;;  %v1155_v42 = vpop.eup %1154 }
0x1279   :  { %v787_v26 = vpop.permute.xlu1 %786 }
0x127a   :  { %v789_v27 = vmul.f32 %v1147_v21, %v787_v26 }
0x127c   :  { %791 = vrot.lane.b32.xlu1 %v789_v27, %s1260_s3 }
0x12ee   :  { %v792_v36 = vpop.permute.xlu1 %791 }
0x12ef   :  { %v794_v39 = vadd.f32 %v1149_v0, %v792_v36 }
0x12f1   :  { %796 = vrot.lane.b32.xlu0 %v794_v39, %s1259_s9 }
0x12f5   :  { %879 = vrot.lane.b32.xlu0 %v1151_v40, %s1260_s3 }
0x12f9   :  { %893 = vrot.lane.b32.xlu0 %v1153_v41, %s1260_s3 }
0x12fd   :  { %907 = vrot.lane.b32.xlu0 %v1155_v42, %s1260_s3 }
0x1363   :  { %v797_v43 = vpop.permute.xlu0 %796 }
0x1364   :  { %874 = vst.msk [vmem:[#allocation8] sm:$0xff] %vm76_vm1, %v797_v43  ;;  %1110 = vmatmul.mubr.msk.f32.vlgmr.msra.gmra.mxu1 %vm76_vm1, %v797_v43 }
0x1367   :  { %v880_v44 = vpop.permute.xlu0 %879 }
0x1368   :  { %v882_v56 = vsel %vm288_vm6, %v880_v44, 0.0 }
0x136b   :  { %v894_v47 = vpop.permute.xlu0 %893 }
0x136c   :  { %v896_v50 = vsel %vm288_vm6, %v894_v47, 0.0 }
0x136f   :  { %v908_v13 = vpop.permute.xlu0 %907 }
0x1370   :  { %v910_v51 = vsel %vm288_vm6, %v908_v13, 0.0 }
0x1424   :  { %v866_v45 = vpop.f32.mrf.mxu1 }
0x1425   :  { %v867_v46 = vadd.f32 %v1341_v6, %v866_v45 }
0x1426   :  { %v1111_v49 = vpop.f32.mrf.mxu1 }
0x1427   :  { %v870_v48 = vsel %vm262_vm2, %v867_v46, -inf }
0x1428   :  { %871 = vmax.xlane.f32.xlu1 %v870_v48 }
0x142c   :  { %897 = vadd.xlane.f32.xlu1 %v896_v50 }
0x1430   :  { %911 = vadd.xlane.f32.xlu1 %v910_v51 }
0x14b1   :  { %v872_v52 = vpop.xlane.xlu1 %871 }
0x14b2   :  { %v917_v53 = vsub.f32 %v867_v46, %v872_v52 }
0x14b4   :  { %v918_v54 = vmul.f32 1.442695, %v917_v53 }
0x14b5   :  { %v898_v6 = vpop.xlane.xlu1 %897 }
0x14b6   :  { %1156 = vpow2.f32 %v918_v54 }
0x14b7   :  { %1158 = vlog2.f32 %v898_v6 }
0x14b9   :  { %v912_v61 = vpop.xlane.xlu1 %911 }
0x14ba   :  { %1160 = vlog2.f32 %v912_v61 }
0x14c3   :  { %v1157_v55 = vpop.eup %1156 }
0x14c4   :  { %921 = vrot.lane.b32.xlu0 %v1157_v55, %s1260_s3  ;;  %v1159_v1 = vpop.eup %1158 }
0x14c5   :  { %v900_v58 = vmul.f32 0.6931472, %v1159_v1 }
0x14c7   :  { %v901_v3 = vadd.f32 %v900_v58, %v1436_v20  ;;  %v1161_v63 = vpop.eup %1160 }
0x14c8   :  { %v914_v7 = vmul.f32 0.6931472, %v1161_v63 }
0x14c9   :  { %v902_v4 = vsub.f32 %v1430_v17, %v901_v3 }
0x14ca   :  { %v915_v17 = vadd.f32 %v914_v7, %v1476_v2 }
0x14cc   :  { %v916_v10 = vsub.f32 %v1470_v57, %v915_v17 }
0x14e3   :  { %883 = vadd.xlane.f32.xlu0 %v882_v56 }
0x14f9   :  { %936 = vrot.lane.b32.xlu0 %v902_v4, %s1262_s11 }
0x1536   :  { %v922_v59 = vpop.permute.xlu0 %921 }
0x1537   :  { %v924_v60 = vsel %vm288_vm6, %v922_v59, 0.0 }
0x1538   :  { %925 = vadd.xlane.f32.xlu1 %v924_v60 }
0x156c   :  { %v884_v62 = vpop.xlane.xlu0 %883 }
0x156d   :  { %1162 = vlog2.f32 %v884_v62 }
0x157a   :  { %v1163_v5 = vpop.eup %1162 }
0x157b   :  { %v886_v8 = vmul.f32 0.6931472, %v1163_v5 }
0x157d   :  { %v887_v9 = vadd.f32 %v886_v8, %v1378_v38 }
0x157f   :  { %v888_v20 = vsub.f32 %v1372_v34, %v887_v9 }
0x1581   :  { %932 = vrot.lane.b32.xlu1 %v888_v20, %s1260_s3 }
0x1585   :  { %940 = vrot.lane.b32.xlu1 %v916_v10, %s1263_s12 }
0x15c1   :  { %v926_v11 = vpop.xlane.xlu1 %925 }
0x15c2   :  { %1164 = vlog2.f32 %v926_v11 }
0x15c3   :  { %1237 = shalt.err (!%p1234_p5)
}
0x15c4   :  { %965 = dma.vmem_to_hbm [thread:$0]  %s963_s14, 128, %s1527_s5, [#allocation4]   ;;  %vm948_vm14 = vcmask 293888   ;;  %v937_v14 = vpop.permute.xlu0 %936  ;;  %vm950_vm15 = vcmask 441344   ;;  %vm952_vm0 = vcmask 588800  }
0x15c5   :  { %s1265_s18 = smov 86  }
0x15cf   :  { %v1165_v34 = vpop.eup %1164 }
0x15d0   :  { %v928_v38 = vmul.f32 0.6931472, %v1165_v34 }
0x15d2   :  { %v929_v57 = vadd.f32 %v928_v38, %v872_v52 }
0x15d4   :  { %v930_v2 = vsub.f32 %v867_v46, %v929_v57 }
0x15d6   :  { %944 = vrot.lane.b32.xlu1 %v930_v2, %s1265_s18 }
0x15f3   :  { %v933_v37 = vpop.permute.xlu1 %932 }
0x15f4   :  { %v947_v15 = vsel %vm288_vm6, %v933_v37, %v937_v14 }
0x15f7   :  { %v941_v12 = vpop.permute.xlu1 %940 }
0x15f8   :  { %v949_v16 = vsel %vm948_vm14, %v947_v15, %v941_v12 }
0x1648   :  { %v945_v18 = vpop.permute.xlu1 %944 }
0x1649   :  { %v951_v19 = vsel %vm950_vm15, %v949_v16, %v945_v18 }
0x164a   :  { %953 = vst.msk [vmem:[%s1526_s4] sm:$0xff] %vm952_vm0, %v951_v19 }
0x164b   :  { %1250 = dma.done.wait [#allocation4], 128  }
0x164c   :  { %1251 = vsyncadd [#allocation4], 4294967168 }
0x164d   :  { %971 = vsyncpa [#allocation3], 1 }
0x164e   :  { %972 = vsyncpa [#allocation6], 1 }
0x164f   :  { %973 = vsyncpa [#allocation4], 1 }

</bundles_post_ra>
